<compile_context>
chip_gen: v6e
topology: v6e:2x2x1
jax: 0.10.0
libtpu: 0.0.40
codegen_flags: <defaults>
</compile_context>

<pallas_src>
import math

import jax
import jax.numpy as jnp
from jax.experimental import pallas as pl
from jax.experimental.pallas import tpu as pltpu


_MAX_LANES = 4096                      # cap on the lane (last) block dim
_TARGET_BLOCK_BYTES = 2 * 1024 * 1024  # ~2 MiB per buffer -> ~12 MiB pipelined
_VMEM_LIMIT_BYTES = 48 * 1024 * 1024   # headroom; < 64 MiB physical on v7x

# Squeezed block dim (size-1, dropped from the kernel ref). Older JAX spells it None.
_SQUEEZED = pl.Squeezed() if hasattr(pl, "Squeezed") else None


def _glu_kernel(out_ref, gate_ref, o_ref):
    # Elementwise hot path: out * sigmoid(gate), math in f32, downcast on store.
    g = gate_ref[...].astype(jnp.float32)
    o = out_ref[...].astype(jnp.float32)
    o_ref[...] = (o * (1.0 / (1.0 + jnp.exp(-g)))).astype(o_ref.dtype)


def _factor_cols(total: int) -> tuple[int, int]:
    """Factor total = rows * cols with cols lane-dense (multiple of 128, <= _MAX_LANES)."""
    if total % 128 == 0:
        m = total // 128
        for d in range(min(m, _MAX_LANES // 128), 0, -1):
            if m % d == 0:
                cols = 128 * d
                return total // cols, cols
    # No 128-multiple factor: any reasonably wide divisor (a full-extent last dim
    # is always a legal block regardless of %128).
    for cols in range(min(total, _MAX_LANES), 127, -1):
        if total % cols == 0:
            return total // cols, cols
    return 1, total


def glu(x: jax.Array, dim: int) -> jax.Array:
    """torch GLU equivalent: out, gate = x.chunk(2, dim); out * sigmoid(gate)."""
    dim = dim % x.ndim
    full = x.shape[dim]
    assert full % 2 == 0, "GLU requires an even size along the split dim"
    half = full // 2

    prefix = math.prod(x.shape[:dim])
    suffix = math.prod(x.shape[dim + 1:])
    total = half * suffix              # contiguous elements per (prefix, half) chunk

    r, c = _factor_cols(total)
    itemsize = jnp.dtype(x.dtype).itemsize

    # Lane (last-dim) tile: full extent unless the degenerate fallback produced a
    # huge un-factorable last dim (then tile with a 128-multiple; edge is masked).
    tc = c if c <= _MAX_LANES else _MAX_LANES
    nc = pl.cdiv(c, tc)

    # Sublane (second-to-last) tile: multiple of 8 or full extent, ~2 MiB/buffer.
    tr = max(1, _TARGET_BLOCK_BYTES // (tc * itemsize))
    if tr >= r:
        tr = r
    else:
        tr = max(8, (tr // 8) * 8)
        if tr >= r:
            tr = r
    nr = pl.cdiv(r, tr)

    # Free, contiguous reshape: row 2p is the "out" chunk for prefix index p,
    # row 2p + 1 is the matching "gate" chunk.  No HBM data movement.
    xv = x.reshape(prefix * 2, r, c)

    blk = (_SQUEEZED, tr, tc)
    in_spec_out = pl.BlockSpec(blk, lambda p, i, j: (2 * p, i, j))
    in_spec_gate = pl.BlockSpec(blk, lambda p, i, j: (2 * p + 1, i, j))
    out_spec = pl.BlockSpec(blk, lambda p, i, j: (p, i, j))

    y = pl.pallas_call(
        _glu_kernel,
        out_shape=jax.ShapeDtypeStruct((prefix, r, c), x.dtype),
        grid_spec=pltpu.PrefetchScalarGridSpec(
            num_scalar_prefetch=0,
            grid=(prefix, nr, nc),
            in_specs=[in_spec_out, in_spec_gate],
            out_specs=out_spec,
        ),
        compiler_params=pltpu.CompilerParams(
            dimension_semantics=("parallel", "parallel", "parallel"),
            vmem_limit_bytes=_VMEM_LIMIT_BYTES,
        ),
    )(xv, xv)   # same HBM buffer passed twice; index maps select the two halves

    half_shape = x.shape[:dim] + (half,) + x.shape[dim + 1:]
    return y.reshape(half_shape)


def glu_reference(x: jax.Array, dim: int) -> jax.Array:
    dim = dim % x.ndim
    half = x.shape[dim] // 2
    out_half = jax.lax.slice_in_dim(x, 0, half, axis=dim)
    gate_half = jax.lax.slice_in_dim(x, half, 2 * half, axis=dim)
    return out_half * jax.nn.sigmoid(gate_half)


if __name__ == "__main__":
    key = jax.random.PRNGKey(0)
    k1, k2, k3 = jax.random.split(key, 3)
    glu_jit = jax.jit(glu, static_argnames=("dim",))

    # Primary check: NCHW input, split along channels (dim=1) as the module uses.
    x = jax.random.normal(k1, (2, 4, 16, 16), dtype=jnp.float32)
    y = jax.block_until_ready(glu_jit(x, dim=1))
    assert y.shape == (2, 2, 16, 16), y.shape
    assert jnp.allclose(y, glu_reference(x, 1), atol=1e-5, rtol=1e-5), "mismatch (NCHW)"

    # Wider-channel case: exercises the lane-dense (cols = 4096) factorization.
    x2 = jax.random.normal(k2, (2, 16, 32, 32), dtype=jnp.float32)
    y2 = jax.block_until_ready(glu_jit(x2, dim=1))
    assert jnp.allclose(y2, glu_reference(x2, 1), atol=1e-5, rtol=1e-5), "mismatch (wide)"

    # Awkward non-128-divisible case: exercises the full-extent fallback blocks.
    x3 = jax.random.normal(k3, (2, 6, 5, 7), dtype=jnp.float32)
    y3 = jax.block_until_ready(glu_jit(x3, dim=1))
    assert jnp.allclose(y3, glu_reference(x3, 1), atol=1e-5, rtol=1e-5), "mismatch (odd)"

    print("KERNEL_OK")
</pallas_src>

<mosaic_0001>
module attributes {stable_mosaic.version = 11 : i64} {
  func.func @_glu_kernel(%arg0: i32, %arg1: i32, %arg2: i32, %arg3: memref<1x1x512xf32, #tpu.memory_space<vmem>>, %arg4: memref<1x1x512xf32, #tpu.memory_space<vmem>>, %arg5: memref<1x1x512xf32, #tpu.memory_space<vmem>>) attributes {dimension_semantics = [#tpu.dimension_semantics<parallel>, #tpu.dimension_semantics<parallel>, #tpu.dimension_semantics<parallel>], iteration_bounds = array<i64: 2, 1, 1>, scalar_prefetch = 0 : i64, scratch_operands = 0 : i64, tpu.core_type = #tpu.core_type<tc>, window_params = [{transform_indices = @transform_0, window_bounds = array<i64: 1, 1, 512>}, {transform_indices = @transform_1, window_bounds = array<i64: 1, 1, 512>}, {transform_indices = @transform_2, window_bounds = array<i64: 1, 1, 512>}]} {
    %c0 = arith.constant 0 : index
    %c0_0 = arith.constant 0 : index
    %c0_1 = arith.constant 0 : index
    %0 = vector.load %arg4[%c0, %c0_0, %c0_1] : memref<1x1x512xf32, #tpu.memory_space<vmem>>, vector<1x1x512xf32>
    %1 = vector.shape_cast %0 : vector<1x1x512xf32> to vector<1x512xf32>
    %c0_2 = arith.constant 0 : index
    %c0_3 = arith.constant 0 : index
    %c0_4 = arith.constant 0 : index
    %2 = vector.load %arg3[%c0_2, %c0_3, %c0_4] : memref<1x1x512xf32, #tpu.memory_space<vmem>>, vector<1x1x512xf32>
    %3 = vector.shape_cast %2 : vector<1x1x512xf32> to vector<1x512xf32>
    %cst = arith.constant 0.000000e+00 : f32
    %4 = vector.broadcast %cst : f32 to vector<1x512xf32>
    %5 = arith.subf %4, %1 : vector<1x512xf32>
    %6 = math.exp %5 : vector<1x512xf32>
    %cst_5 = arith.constant 1.000000e+00 : f32
    %7 = vector.broadcast %cst_5 : f32 to vector<1x512xf32>
    %8 = arith.addf %7, %6 : vector<1x512xf32>
    %cst_6 = arith.constant 1.000000e+00 : f32
    %9 = vector.broadcast %cst_6 : f32 to vector<1x512xf32>
    %10 = arith.divf %9, %8 : vector<1x512xf32>
    %11 = arith.mulf %3, %10 : vector<1x512xf32>
    %c0_7 = arith.constant 0 : index
    %c0_8 = arith.constant 0 : index
    %c0_9 = arith.constant 0 : index
    %12 = vector.load %arg5[%c0_7, %c0_8, %c0_9] : memref<1x1x512xf32, #tpu.memory_space<vmem>>, vector<1x1x512xf32>
    %13 = vector.shape_cast %12 : vector<1x1x512xf32> to vector<1x512xf32>
    %14 = vector.shape_cast %11 : vector<1x512xf32> to vector<1x1x512xf32>
    tpu.vector_store %arg5[%c0_7, %c0_8, %c0_9], %14 {strides = array<i32>} : memref<1x1x512xf32, #tpu.memory_space<vmem>>, vector<1x1x512xf32>,
    return
  }
  func.func @transform_0(%arg0: i32, %arg1: i32, %arg2: i32) -> (i32, i32, i32) {
    %c2_i32 = arith.constant 2 : i32
    %0 = arith.muli %c2_i32, %arg0 : i32
    %c0_i32 = arith.constant 0 : i32
    return %0, %arg1, %arg2 : i32, i32, i32
  }
  func.func @transform_1(%arg0: i32, %arg1: i32, %arg2: i32) -> (i32, i32, i32) {
    %c2_i32 = arith.constant 2 : i32
    %0 = arith.muli %c2_i32, %arg0 : i32
    %c1_i32 = arith.constant 1 : i32
    %1 = arith.addi %0, %c1_i32 : i32
    %c0_i32 = arith.constant 0 : i32
    return %1, %arg1, %arg2 : i32, i32, i32
  }
  func.func @transform_2(%arg0: i32, %arg1: i32, %arg2: i32) -> (i32, i32, i32) {
    %c0_i32 = arith.constant 0 : i32
    return %arg0, %arg1, %arg2 : i32, i32, i32
  }
}

</mosaic_0001>

<bundles_post_ra>
// kernel: glu.1
= control target key start
LH: loop header
LB: loop body
LE: loop exit
PB: predicated region body
PF: predicated region fallthrough
CT: control target
= control target key end

     0   :  { %s498_s9 = smov 0   ;;  %s500_s10 = smov 0   ;;  %s534_s0 = inlined_call_operand.vmem [shape: f32[4,1,512], index: 0, kind: input, shape index: {}, may-alias: {0,1}]   ;;  %s535_s1 = inlined_call_operand.vmem [shape: f32[4,1,512], index: 1, kind: input, shape index: {}, may-alias: {0,1}]   ;;  %s536_s2 = inlined_call_operand.vmem [shape: f32[2,1,512], index: 2, kind: output, shape index: {}]  }
   0x1   :  { %s502_s11 = smov 0  }
   0x2 LB: > { %s31_s12 = sadd.s32 1, %s477_s10  ;;  %p423_p0 = scmp.ge.s32.totalorder %s481_s11, 1  ;;  %s481_s11 = sphi %s502_s11, %s12_s11   ;;  %s477_s10 = sphi %s500_s10, %s538_s10   ;;  %s473_s9 = sphi %s498_s9, %s537_s9  }
   0x3   : > { %p33_p1 = scmp.ge.s32.totalorder %s31_s12, 2  ;;  %p181_p2 = scmp.lt.s32.totalorder %s481_s11, 3 }
   0x5   : > { %s540_s12 = smov (%p33_p1, %s31_s12), 0  ;;  %p182_p3 = pnand %p423_p0, %p181_p2 }
   0x6   : > { %s424_s13 = sshll.u32 (!%p182_p3), %s473_s9, 1  ;;  %p265_p6 = scmp.lt.s32.totalorder (!%p182_p3), %s473_s9, 1 }
   0x7   : > { %185 = sbr.rel (%p182_p3) target bundleno = 53 (0x35), region = 28  ;;  %s248_s14 = sadd.s32 (!%p182_p3), 1, %s424_s13 }
   0x8   : > { %p250_p4 = scmp.lt.s32.totalorder (!%p182_p3), %s248_s14, 3  ;;  %p234_p5 = scmp.lt.s32.totalorder (!%p182_p3), %s424_s13, 3 }
   0xc   : > { %s542_s14 = smov (!%p250_p4, %s248_s14), 3  ;;  %s544_s13 = smov (!%p234_p5, %s424_s13), 3  ;;  %v286_v5 = vlaneseq }
   0xd   : > { %s427_s15 = sshll.u32 %s542_s14, 2  ;;  %s425_s19 = sshll.u32 %s544_s13, 2 }
   0xe   : > { %s260_s18 = scalar_lea.vmem %s535_s1, %s427_s15  ;;  %s546_s9 = smov (!%p265_p6, %s473_s9), 1  ;;  %vm288_vm0 = vcmp.lt.s32.totalorder %v286_v5, 512 }
   0xf   : > { %v277_v0 = vld [vmem:[%s260_s18] sm:$0xf]  ;;  %s244_s22 = scalar_lea.vmem %s534_s0, %s425_s19  ;;  %s428_s23 = sshll.u32 %s546_s9, 2 }
  0x10   : > { %v279_v1 = vsub.f32 0.0, %v277_v0  ;;  %v278_v6 = vld [vmem:[%s244_s22] sm:$0xf]  ;;  %s275_s26 = scalar_lea.vmem %s536_s2, %s428_s23 }
  0x12   : > { %v280_v2 = vmul.f32 1.442695, %v279_v1 }
  0x14   : > { %455 = vpow2.f32 %v280_v2 }
  0x21   : > { %v456_v3 = vpop.eup %455 }
  0x22   : > { %v282_v4 = vadd.f32 1.0, %v456_v3 }
  0x24   : > { %457 = vrcp.f32 %v282_v4 }
  0x31   : > { %v458_v7 = vpop.eup %457 }
  0x32   : > { %v285_v8 = vmul.f32 %v458_v7, %v278_v6 }
  0x34   : > { %290 = vst.msk [vmem:[%s275_s26] sm:$0xf] %vm288_vm0, %v285_v8 }
  0x35 PF: > { %s12_s11 = sadd.s32 1, %s481_s11   ;;  %s537_s9 = smov %s477_s10 }
  0x36   : > { %p9_p7 = scmp.ge.s32.totalorder %s12_s11, 4   ;;  %s538_s10 = smov %s540_s12 }
  0x38   :  { %11 = sbr.rel (!%p9_p7) target bundleno = 2 (0x2), region = 61 }

</bundles_post_ra>
